<compile_context>
chip_gen: v5e
topology: v5e:2x2
jax: 0.10.0
libtpu: 0.0.40
codegen_flags: <defaults>
</compile_context>

<pallas_src>
import functools

import jax
import jax.numpy as jnp
from jax.experimental import pallas as pl
from jax.experimental.pallas import tpu as pltpu

_LANES = 128
_SUBLANES = 8


def _mae_kernel(o_ref, t_ref, out_ref, acc_ref, *, n_elements):
    """Accumulate sum(|o - t|) in a VMEM vector accumulator; emit mean last."""
    i = pl.program_id(0)
    last = pl.num_programs(0) - 1
    tile_rows = o_ref.shape[0]

    @pl.when(i == 0)
    def _():
        acc_ref[...] = jnp.zeros_like(acc_ref)

    diff = jnp.abs(o_ref[...].astype(jnp.float32) - t_ref[...].astype(jnp.float32))

    # Interior steps: plain VPU accumulate (no mask, no cross-lane reduce).
    @pl.when(i < last)
    def _():
        acc_ref[...] += diff

    # Last step: mask elements past the logical end (out-of-bounds rows of a
    # partial final block read unspecified data), then do the single full
    # reduction and the divide by the true element count.
    @pl.when(i == last)
    def _():
        row_ids = i * tile_rows + jax.lax.broadcasted_iota(jnp.int32, diff.shape, 0)
        lane_ids = jax.lax.broadcasted_iota(jnp.int32, diff.shape, 1)
        valid = row_ids * _LANES + lane_ids < n_elements
        acc_ref[...] += jnp.where(valid, diff, jnp.float32(0.0))
        out_ref[0, 0] = jnp.sum(acc_ref[...]) / jnp.float32(n_elements)


def mae_loss(outputs: jax.Array, targets: jax.Array, *, tile_rows: int = 2048) -> jax.Array:
    """Mean absolute error, semantics identical to torch.nn.L1Loss() (mean)."""
    assert outputs.shape == targets.shape, "L1Loss expects matching shapes"
    n_elements = outputs.size

    # Keep native dtype; the kernel casts per-tile to f32 for accumulation.
    o = outputs.reshape(-1)
    t = targets.reshape(-1)

    # Lane/sublane alignment only: pad to a multiple of 8*128 = 1024 elements
    # when necessary (zero-padding both operands contributes |0-0| = 0 and is
    # also excluded by the in-kernel mask).  The common aligned case skips
    # this entirely.
    pad = (-n_elements) % (_SUBLANES * _LANES)
    if pad:
        o = jnp.pad(o, (0, pad))
        t = jnp.pad(t, (0, pad))

    rows = (n_elements + pad) // _LANES                    # multiple of 8
    tile_rows = max(_SUBLANES, (min(tile_rows, rows) // _SUBLANES) * _SUBLANES)
    grid = (pl.cdiv(rows, tile_rows),)

    o2 = o.reshape(rows, _LANES)
    t2 = t.reshape(rows, _LANES)

    kernel = functools.partial(_mae_kernel, n_elements=n_elements)

    out = pl.pallas_call(
        kernel,
        out_shape=jax.ShapeDtypeStruct((1, 1), jnp.float32),
        grid_spec=pltpu.PrefetchScalarGridSpec(
            num_scalar_prefetch=0,
            grid=grid,
            in_specs=[
                pl.BlockSpec((tile_rows, _LANES), lambda i: (i, 0)),
                pl.BlockSpec((tile_rows, _LANES), lambda i: (i, 0)),
            ],
            out_specs=pl.BlockSpec(
                (1, 1), lambda i: (0, 0), memory_space=pltpu.SMEM
            ),
            scratch_shapes=[pltpu.VMEM((tile_rows, _LANES), jnp.float32)],
        ),
        compiler_params=pltpu.CompilerParams(
            dimension_semantics=("arbitrary",),  # sequential reduction axis
        ),
    )(o2, t2)

    return out[0, 0]


if __name__ == "__main__":
    key = jax.random.PRNGKey(0)

    # Primary case: NCHW super-resolution-style output, lane-aligned size.
    k1, k2 = jax.random.split(key)
    outputs = jax.random.normal(k1, (2, 4, 16, 16), dtype=jnp.float32)
    targets = jax.random.normal(k2, (2, 4, 16, 16), dtype=jnp.float32)
    loss = mae_loss(outputs, targets)
    jax.block_until_ready(loss)
    ref = jnp.mean(jnp.abs(outputs - targets))
    assert jnp.allclose(loss, ref, rtol=1e-5, atol=1e-6), (loss, ref)

    # Multi-step grid (exercises the accumulator across several tiles).
    k3, k4 = jax.random.split(k1)
    o_big = jax.random.normal(k3, (2, 4, 32, 32), dtype=jnp.float32)
    t_big = jax.random.normal(k4, (2, 4, 32, 32), dtype=jnp.float32)
    loss_big = mae_loss(o_big, t_big, tile_rows=16)
    jax.block_until_ready(loss_big)
    ref_big = jnp.mean(jnp.abs(o_big - t_big))
    assert jnp.allclose(loss_big, ref_big, rtol=1e-5, atol=1e-6), (loss_big, ref_big)

    # Non-lane-aligned size (exercises the in-kernel tail mask + tiny pad).
    k5, k6 = jax.random.split(k2)
    o_odd = jax.random.normal(k5, (3, 5, 7, 11), dtype=jnp.float32)
    t_odd = jax.random.normal(k6, (3, 5, 7, 11), dtype=jnp.float32)
    loss_odd = mae_loss(o_odd, t_odd)
    jax.block_until_ready(loss_odd)
    ref_odd = jnp.mean(jnp.abs(o_odd - t_odd))
    assert jnp.allclose(loss_odd, ref_odd, rtol=1e-5, atol=1e-6), (loss_odd, ref_odd)

    print("KERNEL_OK")
</pallas_src>

<mosaic_0001>
module attributes {stable_mosaic.version = 11 : i64} {
  func.func @_mae_kernel(%arg0: i32, %arg1: memref<16x128xf32, #tpu.memory_space<vmem>>, %arg2: memref<16x128xf32, #tpu.memory_space<vmem>>, %arg3: memref<1x1xf32, #tpu.memory_space<smem>>, %arg4: memref<16x128xf32, #tpu.memory_space<vmem>>) attributes {dimension_semantics = [#tpu.dimension_semantics<arbitrary>], iteration_bounds = array<i64: 1>, scalar_prefetch = 0 : i64, scratch_operands = 1 : i64, tpu.core_type = #tpu.core_type<tc>, window_params = [{transform_indices = @transform_0, window_bounds = array<i64: 16, 128>}, {transform_indices = @transform_1, window_bounds = array<i64: 16, 128>}, {transform_indices = @transform_2, window_bounds = array<i64: 1, 1>}]} {
    %c0_i32 = arith.constant 0 : i32
    %0 = arith.cmpi eq, %arg0, %c0_i32 : i32
    %1 = arith.extui %0 : i1 to i32
    %c0_i32_0 = arith.constant 0 : i32
    %2 = arith.cmpi ne, %1, %c0_i32_0 : i32
    scf.if %2 {
      %cst = arith.constant 0.000000e+00 : f32
      %13 = vector.broadcast %cst : f32 to vector<16x128xf32>
      %c0_8 = arith.constant 0 : index
      %c0_9 = arith.constant 0 : index
      %14 = vector.load %arg4[%c0_8, %c0_9] : memref<16x128xf32, #tpu.memory_space<vmem>>, vector<16x128xf32>
      tpu.vector_store %arg4[%c0_8, %c0_9], %13 {strides = array<i32>} : memref<16x128xf32, #tpu.memory_space<vmem>>, vector<16x128xf32>,
    } else {
    }
    %c0 = arith.constant 0 : index
    %c0_1 = arith.constant 0 : index
    %3 = vector.load %arg1[%c0, %c0_1] : memref<16x128xf32, #tpu.memory_space<vmem>>, vector<16x128xf32>
    %c0_2 = arith.constant 0 : index
    %c0_3 = arith.constant 0 : index
    %4 = vector.load %arg2[%c0_2, %c0_3] : memref<16x128xf32, #tpu.memory_space<vmem>>, vector<16x128xf32>
    %5 = arith.subf %3, %4 : vector<16x128xf32>
    %6 = math.absf %5 : vector<16x128xf32>
    %c0_i32_4 = arith.constant 0 : i32
    %7 = arith.cmpi slt, %arg0, %c0_i32_4 : i32
    %8 = arith.extui %7 : i1 to i32
    %c0_i32_5 = arith.constant 0 : i32
    %9 = arith.cmpi ne, %8, %c0_i32_5 : i32
    scf.if %9 {
      %c0_8 = arith.constant 0 : index
      %c0_9 = arith.constant 0 : index
      %13 = vector.load %arg4[%c0_8, %c0_9] : memref<16x128xf32, #tpu.memory_space<vmem>>, vector<16x128xf32>
      %14 = arith.addf %13, %6 : vector<16x128xf32>
      %c0_10 = arith.constant 0 : index
      %c0_11 = arith.constant 0 : index
      %15 = vector.load %arg4[%c0_10, %c0_11] : memref<16x128xf32, #tpu.memory_space<vmem>>, vector<16x128xf32>
      tpu.vector_store %arg4[%c0_10, %c0_11], %14 {strides = array<i32>} : memref<16x128xf32, #tpu.memory_space<vmem>>, vector<16x128xf32>,
    } else {
    }
    %c0_i32_6 = arith.constant 0 : i32
    %10 = arith.cmpi eq, %arg0, %c0_i32_6 : i32
    %11 = arith.extui %10 : i1 to i32
    %c0_i32_7 = arith.constant 0 : i32
    %12 = arith.cmpi ne, %11, %c0_i32_7 : i32
    scf.if %12 {
      %c16_i32 = arith.constant 16 : i32
      %13 = arith.muli %arg0, %c16_i32 : i32
      %14 = tpu.iota {dimensions = array<i32: 0>} : vector<16x128xi32>
      %15 = vector.broadcast %13 : i32 to vector<16x128xi32>
      %16 = arith.addi %15, %14 : vector<16x128xi32>
      %17 = tpu.iota {dimensions = array<i32: 1>} : vector<16x128xi32>
      %c128_i32 = arith.constant 128 : i32
      %18 = vector.broadcast %c128_i32 : i32 to vector<16x128xi32>
      %19 = arith.muli %16, %18 : vector<16x128xi32>
      %20 = arith.addi %19, %17 : vector<16x128xi32>
      %c2048_i32 = arith.constant 2048 : i32
      %21 = vector.broadcast %c2048_i32 : i32 to vector<16x128xi32>
      %22 = arith.cmpi slt, %20, %21 : vector<16x128xi32>
      %c0_8 = arith.constant 0 : index
      %c0_9 = arith.constant 0 : index
      %23 = vector.load %arg4[%c0_8, %c0_9] : memref<16x128xf32, #tpu.memory_space<vmem>>, vector<16x128xf32>
      %cst = arith.constant 0.000000e+00 : f32
      %24 = vector.broadcast %cst : f32 to vector<16x128xf32>
      %25 = arith.select %22, %6, %24 : vector<16x128xi1>, vector<16x128xf32>
      %26 = arith.addf %23, %25 : vector<16x128xf32>
      %c0_10 = arith.constant 0 : index
      %c0_11 = arith.constant 0 : index
      %27 = vector.load %arg4[%c0_10, %c0_11] : memref<16x128xf32, #tpu.memory_space<vmem>>, vector<16x128xf32>
      tpu.vector_store %arg4[%c0_10, %c0_11], %26 {strides = array<i32>} : memref<16x128xf32, #tpu.memory_space<vmem>>, vector<16x128xf32>,
      %c0_12 = arith.constant 0 : index
      %c0_13 = arith.constant 0 : index
      %28 = vector.load %arg4[%c0_12, %c0_13] : memref<16x128xf32, #tpu.memory_space<vmem>>, vector<16x128xf32>
      %29 = vector.shape_cast %28 : vector<16x128xf32> to vector<1x16x128xf32>
      %cst_14 = arith.constant dense<0.000000e+00> : vector<1xf32>
      %30 = vector.multi_reduction <add>, %29, %cst_14 [1, 2] : vector<1x16x128xf32> to vector<1xf32>
      %31 = vector.shape_cast %30 : vector<1xf32> to vector<1x1x1xf32>
      %32 = vector.extract %31[0, 0, 0] : f32 from vector<1x1x1xf32>
      %cst_15 = arith.constant 2.048000e+03 : f32
      %33 = arith.divf %32, %cst_15 : f32
      %c0_16 = arith.constant 0 : index
      %c0_17 = arith.constant 0 : index
      %34 = memref.load %arg3[%c0_16, %c0_17] : memref<1x1xf32, #tpu.memory_space<smem>>
      memref.store %33, %arg3[%c0_16, %c0_17] : memref<1x1xf32, #tpu.memory_space<smem>>
    } else {
    }
    return
  }
  func.func @transform_0(%arg0: i32) -> (i32, i32) {
    %c0_i32 = arith.constant 0 : i32
    %c0_i32_0 = arith.constant 0 : i32
    return %arg0, %c0_i32 : i32, i32
  }
  func.func @transform_1(%arg0: i32) -> (i32, i32) {
    %c0_i32 = arith.constant 0 : i32
    %c0_i32_0 = arith.constant 0 : i32
    return %arg0, %c0_i32 : i32, i32
  }
  func.func @transform_2(%arg0: i32) -> (i32, i32) {
    %c0_i32 = arith.constant 0 : i32
    %c0_i32_0 = arith.constant 0 : i32
    %c0_i32_1 = arith.constant 0 : i32
    return %c0_i32, %c0_i32_0 : i32, i32
  }
}

</mosaic_0001>

<bundles_post_ra>
// kernel: tpu_custom_call.1
= control target key start
LH: loop header
LB: loop body
LE: loop exit
PB: predicated region body
PF: predicated region fallthrough
CT: control target
= control target key end

     0   :  { %7 = vsyncpa [#allocation4], 0  ;;  %s242_s0 = inlined_call_operand.hbm [shape: f32[16,128], index: 0, kind: input, shape index: {}]   ;;  %s243_s1 = inlined_call_operand.hbm [shape: f32[16,128], index: 1, kind: input, shape index: {}]   ;;  %s244_s2 = inlined_call_operand.hbm [shape: f32[1,1], index: 2, kind: output, shape index: {}]  }
   0x1   :  { %8 = vsyncpa [#allocation7], 0 }
   0x2   :  { %9 = vsyncpa [#allocation5], 0  ;;  %s14_s11 = sshll.u32 %s242_s0, 4  ;;  %s212_s12 = smov [#allocation3]   ;;  %s15_s11 = int_to_ptr.hbm [resolvable:$true] %s14_s11 }
   0x3   :  { %s16_s13 = sshll.u32 %s212_s12, 4  ;;  %s27_s16 = sshll.u32 %s243_s1, 4  ;;  %s17_s13 = int_to_ptr.vmem [resolvable:$true] %s16_s13  ;;  %s28_s16 = int_to_ptr.hbm [resolvable:$true] %s27_s16 }
   0x4   :  { %s213_s17 = smov 128   ;;  %s214_s18 = smov 8  }
   0x5   :  { %22 = dma.hbm_to_vmem [thread:$0]  %s15_s11, 256, %s17_s13, [#allocation4], %s213_s17, %s213_s17, %s214_s18  }
   0x6   :  { %s215_s19 = smov [#allocation6]  }
   0x7   :  { %s29_s20 = sshll.u32 %s215_s19, 4  ;;  %s30_s20 = int_to_ptr.vmem [resolvable:$true] %s29_s20 }
   0x8   :  { %35 = dma.hbm_to_vmem [thread:$0]  %s28_s16, 256, %s30_s20, [#allocation7], %s213_s17, %s213_s17, %s214_s18  }
   0x9   :  { %206 = dma.done.wait [#allocation4], 256  }
   0xa   :  { %207 = vsyncadd [#allocation4], 4294967040 }
   0xb   :  { %208 = dma.done.wait [#allocation7], 256  }
   0xc   :  { %209 = vsyncadd [#allocation7], 4294967040  ;;  %v72_v0 = vlaneseq  ;;  %v50_v7 = vld [vmem:[#allocation3] sm:$0xff]  ;;  %v51_v8 = vld [vmem:[#allocation3 + $0x8] sm:$0xff]  ;;  %v216_v19 = vmov 2048.0   ;;  %s122_s21 = sshll.u32 %s244_s2, 4  ;;  %s123_s21 = int_to_ptr.hbm [resolvable:$true] %s122_s21 }
   0xd   :  { %v52_v9 = vld [vmem:[#allocation6] sm:$0xff]  ;;  %v53_v10 = vld [vmem:[#allocation6 + $0x8] sm:$0xff]  ;;  %144 = vrcp.f32 %v216_v19  ;;  %s217_s25 = smov [#allocation8]  }
   0xe   :  { %v73_v1 = vshrl.u32 %v72_v0, 7  ;;  %v79_v2 = vand.u32 127, %v72_v0  ;;  %v54_v11 = vsub.f32 %v50_v7, %v52_v9  ;;  %v55_v13 = vsub.f32 %v51_v8, %v53_v10 }
  0x10   :  { %v74_v3 = vadd.s32 8, %v73_v1  ;;  %v80_v4 = vmul.u32 128, %v73_v1  ;;  %v56_v14 = vand.u32 2147483647, %v54_v11  ;;  %v57_v15 = vand.u32 2147483647, %v55_v13 }
  0x12   :  { %v81_v5 = vmul.u32 128, %v74_v3  ;;  %v82_v6 = vadd.s32 %v80_v4, %v79_v2 }
  0x13   :  { %v145_v20 = vpop.eup %144 }
  0x14   :  { %v83_v12 = vadd.s32 %v81_v5, %v79_v2  ;;  %vm84_vm0 = vcmp.lt.s32.totalorder %v82_v6, 2048  ;;  %v107_v21 = vmul.f32 2048.0, %v145_v20  ;;  %vm111_vm2 = vweird.f32 %v145_v20 }
  0x15   :  { %v88_v16 = vsel %vm84_vm0, %v56_v14, 0.0 }
  0x16   :  { %vm85_vm1 = vcmp.lt.s32.totalorder %v83_v12, 2048  ;;  %v108_v22 = vsub.f32 1.0, %v107_v21 }
  0x17   :  { %v89_v17 = vsel %vm85_vm1, %v57_v15, 0.0 }
  0x18   :  { %v96_v18 = vadd.f32 %v89_v17, %v88_v16  ;;  %v109_v26 = vmul.f32 %v145_v20, %v108_v22 }
  0x1a   :  { %97 = vadd.xlane.f32.xlu0 %v96_v18  ;;  %v110_v29 = vadd.f32 %v145_v20, %v109_v26 }
  0x1c   :  { %v112_v32 = vsel %vm111_vm2, %v145_v20, %v110_v29 }
  0x8d   :  { %v98_v23 = vpop.xlane.xlu0 %97 }
  0x8e   :  { %v99_v24 = vrot.slane %v98_v23, 4 }
  0x90   :  { %v100_v25 = vadd.f32 %v99_v24, %v98_v23 }
  0x92   :  { %v101_v27 = vrot.slane %v100_v25, 2 }
  0x94   :  { %v102_v28 = vadd.f32 %v101_v27, %v100_v25 }
  0x96   :  { %v103_v30 = vrot.slane %v102_v28, 1 }
  0x98   :  { %v104_v31 = vadd.f32 %v103_v30, %v102_v28 }
  0x9a   :  { %134 = vpush %v104_v31 }
  0x9b   :  { %136 = vpush %v112_v32 }
  0xcb   :  { %s135_s22 = spop %134 }
  0xcc   :  { %s137_s23 = spop %136 }
  0xcd   :  { %s114_s24 = smul.f32 %s137_s23, %s135_s22 }
  0xcf   :  { %116 = sst [smem:[#allocation8]] %s114_s24 }
  0xd0   :  { %125 = dma.smem_to_hbm %s217_s25, 16, %s123_s21, [#allocation5]  }
  0xd1   :  { %210 = dma.done.wait [#allocation5], 16  }
  0xd2   :  { %211 = vsyncadd [#allocation5], 4294967280 }
  0xd3   :  { %130 = sfence }
  0xd4   :  { %131 = vsyncpa [#allocation4], 1 }
  0xd5   :  { %132 = vsyncpa [#allocation7], 1 }
  0xd6   :  { %133 = vsyncpa [#allocation5], 1 }

</bundles_post_ra>
